<compile_context>
chip_gen: v6e
topology: v6e:2x2x1
jax: 0.10.0
libtpu: 0.0.40
codegen_flags: <defaults>
</compile_context>

<pallas_src>
import jax
import jax.numpy as jnp
from jax.experimental import pallas as pl
from jax.experimental.pallas import tpu as pltpu


NUM_LAYERS = 4
PAD = 128  # lane-dense padded width for every layer


def mlp_kernel(x_ref, w_ref, b_ref, o_ref):
    # x_ref: (TB, F) f32    w_ref: (4, 128, 128) bf16
    # b_ref: (4, 1, 128) f32    o_ref: (TB, 128) f32
    f_in = x_ref.shape[-1]
    h = x_ref[...]                                     # (TB, F) f32

    for l in range(NUM_LAYERS):
        w = w_ref[l]                                   # (128, 128) bf16
        if l == 0 and f_in != PAD:
            w = w[:f_in, :]                            # static slice: unpadded input width
        # bf16 operands into the MXU, f32 accumulation.
        z = jnp.dot(h.astype(jnp.bfloat16), w, preferred_element_type=jnp.float32)
        z = z + b_ref[l]                               # (1,128) f32 sublane-broadcast add
        if l < NUM_LAYERS - 1:
            h = jnp.maximum(z, 0.0)                    # ReLU (padded lanes stay 0)
        else:
            h = z                                      # logits; padded cols ~ -1e30

    # Numerically-stable softmax over the lane-dense 128-wide class dim.
    z = h - jnp.max(h, axis=-1, keepdims=True)
    e = jnp.exp(z)                                     # padded cols -> exactly 0
    denom = jnp.sum(e, axis=-1, keepdims=True)
    r = pl.reciprocal(denom, approx=True)              # EUP slot (~free)
    r = r * (2.0 - denom * r)                          # one Newton step -> near-exact
    o_ref[...] = e * r


def _round_up(a, m):
    return (a + m - 1) // m * m


def init_params(key, input_dim, output_dim):
    """PyTorch-style init (uniform +/- 1/sqrt(fan_in)); weights stored as (in, out)."""
    dims = [(input_dim, 64), (64, 32), (32, 16), (16, output_dim)]
    params = []
    for fan_in, fan_out in dims:
        key, kw, kb = jax.random.split(key, 3)
        bound = 1.0 / (fan_in ** 0.5)
        w = jax.random.uniform(kw, (fan_in, fan_out), jnp.float32, -bound, bound)
        b = jax.random.uniform(kb, (fan_out,), jnp.float32, -bound, bound)
        params.extend([w, b])
    return tuple(params)


def pack_params(params, output_dim):
    """Pad every layer to 128x128, stack into one bf16 weight slab + one f32 bias slab."""
    ws = params[0::2]
    bs = params[1::2]
    w_stack = jnp.zeros((NUM_LAYERS, PAD, PAD), jnp.float32)
    b_stack = jnp.zeros((NUM_LAYERS, 1, PAD), jnp.float32)
    for l, (w, b) in enumerate(zip(ws, bs)):
        fan_in, fan_out = w.shape
        w_stack = w_stack.at[l, :fan_in, :fan_out].set(w)
        b_stack = b_stack.at[l, 0, :fan_out].set(b)
    # Padded logit columns -> very negative so softmax assigns them exactly 0.
    # Kept in f32 (not bf16) so the sentinel and bias precision survive.
    b_stack = b_stack.at[NUM_LAYERS - 1, 0, output_dim:].set(-1e30)
    return w_stack.astype(jnp.bfloat16), b_stack


def mlp_forward(x, w_stack, b_stack, output_dim):
    B, F = x.shape
    # Fixed-ish tile: bounds batch-padding waste to < one tile and gives >=2 grid
    # steps (megacore sharding on v7x) once the batch exceeds 128.
    TB = min(128, _round_up(B, 8))
    B_pad = _round_up(B, TB)

    # Only batch-dim padding in the wrapper; feature dim stays at its natural width.
    if B_pad != B:
        x = jnp.zeros((B_pad, F), x.dtype).at[:B].set(x)

    out = pl.pallas_call(
        mlp_kernel,
        out_shape=jax.ShapeDtypeStruct((B_pad, PAD), jnp.float32),
        grid_spec=pltpu.PrefetchScalarGridSpec(
            num_scalar_prefetch=0,
            grid=(B_pad // TB,),
            in_specs=[
                pl.BlockSpec((TB, F), lambda i: (i, 0)),
                # Constant index_map: weights/biases are DMA'd once and stay VMEM-resident.
                pl.BlockSpec((NUM_LAYERS, PAD, PAD), lambda i: (0, 0, 0)),
                pl.BlockSpec((NUM_LAYERS, 1, PAD), lambda i: (0, 0, 0)),
            ],
            out_specs=pl.BlockSpec((TB, PAD), lambda i: (i, 0)),
        ),
        compiler_params=pltpu.CompilerParams(
            dimension_semantics=("parallel",)),
    )(x, w_stack, b_stack)

    # Strip batch padding and the padded class columns.
    # (If the consumer can take the lane-dense (B_pad, 128) slab directly, skip this slice.)
    return out[:B, :output_dim]


def reference_forward(x, params):
    """Pure-JAX f32 reference (mirrors the PyTorch module exactly)."""
    h = x
    for l in range(NUM_LAYERS - 1):
        h = jnp.maximum(h @ params[2 * l] + params[2 * l + 1], 0.0)
    z = h @ params[2 * (NUM_LAYERS - 1)] + params[2 * (NUM_LAYERS - 1) + 1]
    z = z - jnp.max(z, axis=-1, keepdims=True)
    e = jnp.exp(z)
    return e / jnp.sum(e, axis=-1, keepdims=True)


if __name__ == "__main__":
    # digits-like setup: 64 input features, 10 classes, batch=8
    batch, input_dim, output_dim = 8, 64, 10

    key = jax.random.PRNGKey(0)
    key, kx = jax.random.split(key)
    x = jax.random.normal(kx, (batch, input_dim), dtype=jnp.float32)

    params = init_params(key, input_dim, output_dim)
    w_stack, b_stack = pack_params(params, output_dim)

    out = mlp_forward(x, w_stack, b_stack, output_dim)
    out = jax.block_until_ready(out)

    expected = reference_forward(x, params)

    assert out.shape == (batch, output_dim)
    # softmax rows sum to 1 (Newton-refined reciprocal -> tight)
    assert jnp.allclose(jnp.sum(out, axis=-1), 1.0, atol=1e-3)
    # bf16 matmul operands: error budget well inside 5e-3 for this net
    assert jnp.allclose(out, expected, atol=5e-3, rtol=5e-3)

    print("KERNEL_OK")
</pallas_src>

<mosaic_0001>
module attributes {stable_mosaic.version = 11 : i64} {
  func.func @mlp_kernel(%arg0: i32, %arg1: memref<8x64xf32, #tpu.memory_space<vmem>>, %arg2: memref<4x128x128xbf16, #tpu.memory_space<vmem>>, %arg3: memref<4x1x128xf32, #tpu.memory_space<vmem>>, %arg4: memref<8x128xf32, #tpu.memory_space<vmem>>) attributes {dimension_semantics = [#tpu.dimension_semantics<parallel>], iteration_bounds = array<i64: 1>, scalar_prefetch = 0 : i64, scratch_operands = 0 : i64, tpu.core_type = #tpu.core_type<tc>, window_params = [{transform_indices = @transform_0, window_bounds = array<i64: 8, 64>}, {pipeline_mode = #tpu.pipeline_mode<synchronous>, transform_indices = @transform_1, window_bounds = array<i64: 4, 128, 128>}, {pipeline_mode = #tpu.pipeline_mode<synchronous>, transform_indices = @transform_2, window_bounds = array<i64: 4, 1, 128>}, {transform_indices = @transform_3, window_bounds = array<i64: 8, 128>}]} {
    %c0 = arith.constant 0 : index
    %c0_0 = arith.constant 0 : index
    %0 = vector.load %arg1[%c0, %c0_0] : memref<8x64xf32, #tpu.memory_space<vmem>>, vector<8x64xf32>
    %c0_1 = arith.constant 0 : index
    %c0_2 = arith.constant 0 : index
    %c0_3 = arith.constant 0 : index
    %1 = vector.load %arg2[%c0_1, %c0_2, %c0_3] : memref<4x128x128xbf16, #tpu.memory_space<vmem>>, vector<1x128x128xbf16>
    %2 = vector.shape_cast %1 : vector<1x128x128xbf16> to vector<128x128xbf16>
    %3 = vector.extract_strided_slice %2 {offsets = [0, 0], sizes = [64, 128], strides = [1, 1]} : vector<128x128xbf16> to vector<64x128xbf16>
    %4 = arith.truncf %0 : vector<8x64xf32> to vector<8x64xbf16>
    %cst = arith.constant dense<0.000000e+00> : vector<8x128xf32>
    %5 = tpu.matmul %4, %3, %cst {dimension_numbers = #tpu.dot_dimension_numbers<[1], [0], [0], [1], [0, 0, 1, 1], [], []>} : vector<8x64xbf16>, vector<64x128xbf16>, vector<8x128xf32> -> vector<8x128xf32>
    %c0_4 = arith.constant 0 : index
    %c0_5 = arith.constant 0 : index
    %c0_6 = arith.constant 0 : index
    %6 = vector.load %arg3[%c0_4, %c0_5, %c0_6] : memref<4x1x128xf32, #tpu.memory_space<vmem>>, vector<1x1x128xf32>
    %7 = vector.shape_cast %6 : vector<1x1x128xf32> to vector<1x128xf32>
    %8 = vector.broadcast %7 : vector<1x128xf32> to vector<8x128xf32>
    %9 = arith.addf %5, %8 : vector<8x128xf32>
    %cst_7 = arith.constant 0.000000e+00 : f32
    %10 = vector.broadcast %cst_7 : f32 to vector<8x128xf32>
    %11 = arith.maximumf %9, %10 : vector<8x128xf32>
    %c1 = arith.constant 1 : index
    %c0_8 = arith.constant 0 : index
    %c0_9 = arith.constant 0 : index
    %12 = vector.load %arg2[%c1, %c0_8, %c0_9] : memref<4x128x128xbf16, #tpu.memory_space<vmem>>, vector<1x128x128xbf16>
    %13 = vector.shape_cast %12 : vector<1x128x128xbf16> to vector<128x128xbf16>
    %14 = arith.truncf %11 : vector<8x128xf32> to vector<8x128xbf16>
    %cst_10 = arith.constant dense<0.000000e+00> : vector<8x128xf32>
    %15 = tpu.matmul %14, %13, %cst_10 {dimension_numbers = #tpu.dot_dimension_numbers<[1], [0], [0], [1], [0, 0, 1, 1], [], []>} : vector<8x128xbf16>, vector<128x128xbf16>, vector<8x128xf32> -> vector<8x128xf32>
    %c1_11 = arith.constant 1 : index
    %c0_12 = arith.constant 0 : index
    %c0_13 = arith.constant 0 : index
    %16 = vector.load %arg3[%c1_11, %c0_12, %c0_13] : memref<4x1x128xf32, #tpu.memory_space<vmem>>, vector<1x1x128xf32>
    %17 = vector.shape_cast %16 : vector<1x1x128xf32> to vector<1x128xf32>
    %18 = vector.broadcast %17 : vector<1x128xf32> to vector<8x128xf32>
    %19 = arith.addf %15, %18 : vector<8x128xf32>
    %cst_14 = arith.constant 0.000000e+00 : f32
    %20 = vector.broadcast %cst_14 : f32 to vector<8x128xf32>
    %21 = arith.maximumf %19, %20 : vector<8x128xf32>
    %c2 = arith.constant 2 : index
    %c0_15 = arith.constant 0 : index
    %c0_16 = arith.constant 0 : index
    %22 = vector.load %arg2[%c2, %c0_15, %c0_16] : memref<4x128x128xbf16, #tpu.memory_space<vmem>>, vector<1x128x128xbf16>
    %23 = vector.shape_cast %22 : vector<1x128x128xbf16> to vector<128x128xbf16>
    %24 = arith.truncf %21 : vector<8x128xf32> to vector<8x128xbf16>
    %cst_17 = arith.constant dense<0.000000e+00> : vector<8x128xf32>
    %25 = tpu.matmul %24, %23, %cst_17 {dimension_numbers = #tpu.dot_dimension_numbers<[1], [0], [0], [1], [0, 0, 1, 1], [], []>} : vector<8x128xbf16>, vector<128x128xbf16>, vector<8x128xf32> -> vector<8x128xf32>
    %c2_18 = arith.constant 2 : index
    %c0_19 = arith.constant 0 : index
    %c0_20 = arith.constant 0 : index
    %26 = vector.load %arg3[%c2_18, %c0_19, %c0_20] : memref<4x1x128xf32, #tpu.memory_space<vmem>>, vector<1x1x128xf32>
    %27 = vector.shape_cast %26 : vector<1x1x128xf32> to vector<1x128xf32>
    %28 = vector.broadcast %27 : vector<1x128xf32> to vector<8x128xf32>
    %29 = arith.addf %25, %28 : vector<8x128xf32>
    %cst_21 = arith.constant 0.000000e+00 : f32
    %30 = vector.broadcast %cst_21 : f32 to vector<8x128xf32>
    %31 = arith.maximumf %29, %30 : vector<8x128xf32>
    %c3 = arith.constant 3 : index
    %c0_22 = arith.constant 0 : index
    %c0_23 = arith.constant 0 : index
    %32 = vector.load %arg2[%c3, %c0_22, %c0_23] : memref<4x128x128xbf16, #tpu.memory_space<vmem>>, vector<1x128x128xbf16>
    %33 = vector.shape_cast %32 : vector<1x128x128xbf16> to vector<128x128xbf16>
    %34 = arith.truncf %31 : vector<8x128xf32> to vector<8x128xbf16>
    %cst_24 = arith.constant dense<0.000000e+00> : vector<8x128xf32>
    %35 = tpu.matmul %34, %33, %cst_24 {dimension_numbers = #tpu.dot_dimension_numbers<[1], [0], [0], [1], [0, 0, 1, 1], [], []>} : vector<8x128xbf16>, vector<128x128xbf16>, vector<8x128xf32> -> vector<8x128xf32>
    %c3_25 = arith.constant 3 : index
    %c0_26 = arith.constant 0 : index
    %c0_27 = arith.constant 0 : index
    %36 = vector.load %arg3[%c3_25, %c0_26, %c0_27] : memref<4x1x128xf32, #tpu.memory_space<vmem>>, vector<1x1x128xf32>
    %37 = vector.shape_cast %36 : vector<1x1x128xf32> to vector<1x128xf32>
    %38 = vector.broadcast %37 : vector<1x128xf32> to vector<8x128xf32>
    %39 = arith.addf %35, %38 : vector<8x128xf32>
    %cst_28 = arith.constant dense<0xFF800000> : vector<8xf32>
    %40 = vector.multi_reduction <maximumf>, %39, %cst_28 [1] : vector<8x128xf32> to vector<8xf32>
    %41 = vector.shape_cast %40 : vector<8xf32> to vector<8x1xf32>
    %42 = vector.broadcast %41 : vector<8x1xf32> to vector<8x128xf32>
    %43 = arith.subf %39, %42 : vector<8x128xf32>
    %44 = math.exp %43 : vector<8x128xf32>
    %cst_29 = arith.constant dense<0.000000e+00> : vector<8xf32>
    %45 = vector.multi_reduction <add>, %44, %cst_29 [1] : vector<8x128xf32> to vector<8xf32>
    %46 = vector.shape_cast %45 : vector<8xf32> to vector<8x1xf32>
    %47 = tpu.reciprocal %46 {approx = true} : vector<8x1xf32> -> vector<8x1xf32>
    %48 = arith.mulf %46, %47 : vector<8x1xf32>
    %cst_30 = arith.constant 2.000000e+00 : f32
    %49 = vector.broadcast %cst_30 : f32 to vector<8x1xf32>
    %50 = arith.subf %49, %48 : vector<8x1xf32>
    %51 = arith.mulf %47, %50 : vector<8x1xf32>
    %52 = vector.broadcast %51 : vector<8x1xf32> to vector<8x128xf32>
    %53 = arith.mulf %44, %52 : vector<8x128xf32>
    %c0_31 = arith.constant 0 : index
    %c0_32 = arith.constant 0 : index
    %54 = vector.load %arg4[%c0_31, %c0_32] : memref<8x128xf32, #tpu.memory_space<vmem>>, vector<8x128xf32>
    tpu.vector_store %arg4[%c0_31, %c0_32], %53 {strides = array<i32>} : memref<8x128xf32, #tpu.memory_space<vmem>>, vector<8x128xf32>,
    return
  }
  func.func @transform_0(%arg0: i32) -> (i32, i32) {
    %c0_i32 = arith.constant 0 : i32
    %c0_i32_0 = arith.constant 0 : i32
    return %arg0, %c0_i32 : i32, i32
  }
  func.func @transform_1(%arg0: i32) -> (i32, i32, i32) {
    %c0_i32 = arith.constant 0 : i32
    %c0_i32_0 = arith.constant 0 : i32
    %c0_i32_1 = arith.constant 0 : i32
    %c0_i32_2 = arith.constant 0 : i32
    return %c0_i32, %c0_i32_0, %c0_i32_1 : i32, i32, i32
  }
  func.func @transform_2(%arg0: i32) -> (i32, i32, i32) {
    %c0_i32 = arith.constant 0 : i32
    %c0_i32_0 = arith.constant 0 : i32
    %c0_i32_1 = arith.constant 0 : i32
    %c0_i32_2 = arith.constant 0 : i32
    return %c0_i32, %c0_i32_0, %c0_i32_1 : i32, i32, i32
  }
  func.func @transform_3(%arg0: i32) -> (i32, i32) {
    %c0_i32 = arith.constant 0 : i32
    %c0_i32_0 = arith.constant 0 : i32
    return %arg0, %c0_i32 : i32, i32
  }
}

</mosaic_0001>

<bundles_post_ra>
// kernel: tpu_custom_call.1
= control target key start
LH: loop header
LB: loop body
LE: loop exit
PB: predicated region body
PF: predicated region fallthrough
CT: control target
= control target key end

     0   :  { %8 = vsyncpa [#allocation3], 0  ;;  %s857_s0 = inlined_call_operand.hbm [shape: f32[8,64], index: 0, kind: input, shape index: {}]   ;;  %s858_s1 = inlined_call_operand.hbm [shape: bf16[4,128,128], index: 1, kind: input, shape index: {}]   ;;  %s859_s2 = inlined_call_operand.hbm [shape: f32[4,1,128], index: 2, kind: input, shape index: {}]   ;;  %s860_s3 = inlined_call_operand.hbm [shape: f32[8,128], index: 3, kind: output, shape index: {}]  }
   0x1   :  { %9 = vsyncpa [#allocation6], 0 }
   0x2   :  { %10 = vsyncpa [#allocation4], 0  ;;  %s779_s12 = smov [#allocation5]  }
   0x3   :  { %s26_s13 = sshll.u32 %s779_s12, 4  ;;  %s27_s13 = int_to_ptr.vmem [resolvable:$true] %s26_s13 }
   0x4   :  { %s701_s14 = scalar_lea.vmem %s27_s13, 4096  ;;  %p706_p1 = scmp.lt.s32.totalorder %s27_s13, %s27_s13 }
   0x5   :  { %p702_p0 = scmp.ne.s32.totalorder %s27_s13, %s701_s14  ;;  %p707_p2 = scmp.lt.s32.totalorder %s701_s14, %s701_s14 }
   0x7   :  { %p708_p3 = por %p707_p2, %p706_p1 }
   0x9   :  { %p709_p4 = pnand %p708_p3, %p702_p0 }
   0xb   :  { %712 = shalt.err (!%p709_p4)
}
   0xc   :  { %s780_s15 = smov 64   ;;  %s781_s16 = smov 4  }
   0xd   :  { %32 = dma.hbm_to_vmem [thread:$0]  %s858_s1, 4096, %s27_s13, [#allocation6], %s780_s15, %s780_s15, %s781_s16  }
   0xe   :  { %s782_s19 = smov [#allocation2]   ;;  %s783_s21 = smov [#allocation7]  }
   0xf   :  { %s17_s20 = sshll.u32 %s782_s19, 4  ;;  %s38_s22 = sshll.u32 %s783_s21, 4  ;;  %s18_s20 = int_to_ptr.vmem [resolvable:$true] %s17_s20  ;;  %s39_s22 = int_to_ptr.vmem [resolvable:$true] %s38_s22 }
  0x10   :  { %s721_s23 = scalar_lea.vmem %s18_s20, 128  ;;  %p726_p6 = scmp.lt.s32.totalorder %s18_s20, %s18_s20 }
  0x11   :  { %p722_p5 = scmp.ne.s32.totalorder %s18_s20, %s721_s23  ;;  %p727_p7 = scmp.lt.s32.totalorder %s721_s23, %s721_s23 }
  0x13   :  { %p728_p8 = por %p727_p7, %p726_p6 }
  0x15   :  { %p729_p9 = pnand %p728_p8, %p722_p5 }
  0x17   :  { %732 = shalt.err (!%p729_p9)
}
  0x18   :  { %20 = dma.hbm_to_vmem [thread:$0]  %s857_s0, 128, %s18_s20, [#allocation3]  }
  0x19   :  { %s741_s26 = scalar_lea.vmem %s39_s22, 64  ;;  %p746_p11 = scmp.lt.s32.totalorder %s39_s22, %s39_s22 }
  0x1a   :  { %p742_p10 = scmp.ne.s32.totalorder %s39_s22, %s741_s26  ;;  %p747_p12 = scmp.lt.s32.totalorder %s741_s26, %s741_s26 }
  0x1c   :  { %p748_p13 = por %p747_p12, %p746_p11 }
  0x1e   :  { %p749_p0 = pnand %p748_p13, %p742_p10 }
  0x20   :  { %752 = shalt.err (!%p749_p0)
}
  0x21   :  { %s784_s1 = smov 16   ;;  %s785_s27 = smov 1  }
  0x22   :  { %44 = dma.hbm_to_vmem [thread:$0]  %s859_s2, 64, %s39_s22, [#allocation6], %s784_s1, %s784_s1, %s785_s27  }
  0x23   :  { %773 = dma.done.wait [#allocation3], 128  }
  0x24   :  { %774 = vsyncadd [#allocation3], 4294967168 }
  0x25   :  { %775 = dma.done.wait [#allocation6], 4160  }
  0x26   :  { %776 = vsyncadd [#allocation6], 4294963136  ;;  %v786_v0 = vmov 0.0   ;;  %vm787_vm0 = vmmov 0   ;;  %v661_v1 = vld [vmem:[#allocation5 + $0x18] sm:$0xff]   ;;  %v662_v2 = vld [vmem:[#allocation5 + $0x10] sm:$0xff]  }
  0x27   :  { %579 = vmatprep.subr.bf16.mxu0 %v786_v0  ;;  %587 = vmatprep.mubr.msk.bf16.mxu0 %vm787_vm0, %v786_v0  ;;  %v665_v3 = vld [vmem:[#allocation5 + $0x78] sm:$0xff]   ;;  %v663_v4 = vld [vmem:[#allocation5 + $0x8] sm:$0xff]   ;;  %v666_v5 = vld [vmem:[#allocation5 + $0x70] sm:$0xff]   ;;  %vm96_vm1 = vcmask 523264   ;;  %s788_s0 = smov [#allocation8]  }
  0x28   :  { %591 = vmatprep.subr.bf16.mxu1 %v786_v0  ;;  %607 = vmatprep.mubr.msk.bf16.mxu1 %vm787_vm0, %v786_v0  ;;  %v664_v6 = vld [vmem:[#allocation5] sm:$0xff]   ;;  %v55_v7 = vld [vmem:[#allocation2] sm:$0xff]  ;;  %v667_v8 = vld [vmem:[#allocation5 + $0x68] sm:$0xff]   ;;  %s504_s2 = sshll.u32 %s788_s0, 4  ;;  %s505_s2 = int_to_ptr.vmem [resolvable:$true] %s504_s2 }
  0x29   :  { %580 = vmatpush3.bf16.msra.mxu0 %v661_v1  ;;  %592 = vmatpush3.bf16.msra.mxu1 %v665_v3  ;;  %v64_v9 = vpack.c.bf16 %v55_v7, %v55_v7  ;;  %v668_v10 = vld [vmem:[#allocation5 + $0x60] sm:$0xff]   ;;  %v669_v11 = vld [vmem:[#allocation5 + $0x58] sm:$0xff]   ;;  %v670_v12 = vld [vmem:[#allocation5 + $0x50] sm:$0xff]   ;;  %s753_s30 = scalar_lea.vmem %s505_s2, 128  ;;  %p758_p2 = scmp.lt.s32.totalorder %s505_s2, %s505_s2 }
  0x2a   :  { %581 = vmatprep.subr.bf16.mxu0 %v786_v0  ;;  %593 = vmatprep.subr.bf16.mxu1 %v786_v0  ;;  %v671_v13 = vld [vmem:[#allocation5 + $0x48] sm:$0xff]   ;;  %v672_v14 = vld [vmem:[#allocation5 + $0x40] sm:$0xff]   ;;  %v673_v15 = vld [vmem:[#allocation5 + $0xb8] sm:$0xff]   ;;  %p754_p1 = scmp.ne.s32.totalorder %s505_s2, %s753_s30  ;;  %p759_p3 = scmp.lt.s32.totalorder %s753_s30, %s753_s30 }
  0x2b   :  { %v674_v16 = vld [vmem:[#allocation5 + $0xb0] sm:$0xff]   ;;  %v675_v17 = vld [vmem:[#allocation5 + $0xa8] sm:$0xff]   ;;  %v676_v18 = vld [vmem:[#allocation5 + $0xa0] sm:$0xff]  }
  0x2c   :  { %v677_v19 = vld [vmem:[#allocation5 + $0x98] sm:$0xff]   ;;  %v678_v20 = vld [vmem:[#allocation5 + $0x90] sm:$0xff]   ;;  %v514_v21 = vld [vmem:[#allocation7] ss:$0 sm:$0xff]  ;;  %p760_p4 = por %p759_p3, %p758_p2 }
  0x2d   :  { %582 = vmatpush3.bf16.msra.mxu0 %v662_v2  ;;  %594 = vmatpush3.bf16.msra.mxu1 %v666_v5  ;;  %v679_v29 = vld [vmem:[#allocation5 + $0x88] sm:$0xff]   ;;  %v680_v30 = vld [vmem:[#allocation5 + $0x80] sm:$0xff]   ;;  %v681_v31 = vld [vmem:[#allocation5 + $0xf8] sm:$0xff]  }
  0x2e   :  { %583 = vmatprep.subr.bf16.mxu0 %v786_v0  ;;  %595 = vmatprep.subr.bf16.mxu1 %v786_v0  ;;  %v682_v32 = vld [vmem:[#allocation5 + $0xf0] sm:$0xff]   ;;  %v683_v33 = vld [vmem:[#allocation5 + $0xe8] sm:$0xff]   ;;  %v684_v34 = vld [vmem:[#allocation5 + $0xe0] sm:$0xff]   ;;  %p761_p5 = pnand %p760_p4, %p754_p1 }
  0x2f   :  { %v685_v35 = vld [vmem:[#allocation5 + $0xd8] sm:$0xff]   ;;  %v686_v36 = vld [vmem:[#allocation5 + $0xd0] sm:$0xff]   ;;  %v520_v37 = vld [vmem:[#allocation7 + $0x1] ss:$0 sm:$0xff] }
  0x30   :  { %v687_v45 = vld [vmem:[#allocation5 + $0xc8] sm:$0xff]   ;;  %v688_v46 = vld [vmem:[#allocation5 + $0xc0] sm:$0xff]  }
  0x31   :  { %584 = vmatpush3.bf16.msra.mxu0 %v663_v4  ;;  %596 = vmatpush3.bf16.msra.mxu1 %v667_v8  ;;  %v529_v47 = vld [vmem:[#allocation7 + $0x2] ss:$0 sm:$0xff]  ;;  %v538_v55 = vld [vmem:[#allocation7 + $0x3] ss:$0 sm:$0xff] }
  0x32   :  { %585 = vmatprep.subr.bf16.mxu0 %v786_v0  ;;  %597 = vmatprep.subr.bf16.mxu1 %v786_v0 }
  0x35   :  { %586 = vmatpush3.bf16.msra.mxu0 %v664_v6  ;;  %598 = vmatpush3.bf16.msra.mxu1 %v668_v10 }
  0x36   :  { %611 = vmatprep.subr.bf16.mxu0 %v786_v0  ;;  %599 = vmatprep.subr.bf16.mxu1 %v786_v0 }
  0x38   :  { %588 = vmatmul.mubr.msk.bf16.vlgmr.msra.gmra.mxu0 %vm96_vm1, %v64_v9 }
  0x39   :  { %627 = vmatprep.mubr.msk.bf16.mxu0 %vm787_vm0, %v786_v0  ;;  %600 = vmatpush3.bf16.msra.mxu1 %v669_v11 }
  0x3a   :  { %601 = vmatprep.subr.bf16.mxu1 %v786_v0  ;;  %612 = vmatpush3.bf16.msra.mxu0 %v673_v15 }
  0x3b   :  { %613 = vmatprep.subr.bf16.mxu0 %v786_v0 }
  0x3d   :  { %602 = vmatpush3.bf16.msra.mxu1 %v670_v12 }
  0x3e   :  { %603 = vmatprep.subr.bf16.mxu1 %v786_v0  ;;  %614 = vmatpush3.bf16.msra.mxu0 %v674_v16 }
  0x3f   :  { %615 = vmatprep.subr.bf16.mxu0 %v786_v0 }
  0x41   :  { %604 = vmatpush3.bf16.msra.mxu1 %v671_v13 }
  0x42   :  { %605 = vmatprep.subr.bf16.mxu1 %v786_v0  ;;  %616 = vmatpush3.bf16.msra.mxu0 %v675_v17 }
  0x43   :  { %617 = vmatprep.subr.bf16.mxu0 %v786_v0 }
  0x45   :  { %606 = vmatpush3.bf16.msra.mxu1 %v672_v14 }
  0x46   :  { %631 = vmatprep.subr.bf16.mxu1 %v786_v0  ;;  %618 = vmatpush3.bf16.msra.mxu0 %v676_v18 }
  0x47   :  { %619 = vmatprep.subr.bf16.mxu0 %v786_v0 }
  0x4a   :  { %620 = vmatpush3.bf16.msra.mxu0 %v677_v19 }
  0x4b   :  { %621 = vmatprep.subr.bf16.mxu0 %v786_v0 }
  0x4e   :  { %622 = vmatpush3.bf16.msra.mxu0 %v678_v20 }
  0x4f   :  { %623 = vmatprep.subr.bf16.mxu0 %v786_v0 }
  0x52   :  { %624 = vmatpush3.bf16.msra.mxu0 %v679_v29 }
  0x53   :  { %625 = vmatprep.subr.bf16.mxu0 %v786_v0 }
  0x56   :  { %626 = vmatpush3.bf16.msra.mxu0 %v680_v30 }
  0xf8   :  { %v134_v22 = vpop.f32.mrf.mxu0 }
  0xf9   :  { %v135_v23 = vadd.f32 %v514_v21, %v134_v22 }
  0xfa   :  { %v589_v24 = vpop.f32.mrf.mxu0 }
  0xfb   :  { %v140_v25 = vmax.f32 %v135_v23, 0.0 }
  0xfc   :  { %v137_v26 = vpop.f32.mrf.mxu0 }
  0xfd   :  { %v158_v27 = vpack.c.bf16 %v140_v25, %v140_v25 }
  0xfe   :  { %v590_v28 = vpop.f32.mrf.mxu0 }
  0xff   :  { %608 = vmatmul.mubr.bf16.vlgmr.msra.gmra.mxu1 %v158_v27 }
 0x100   :  { %647 = vmatprep.mubr.msk.bf16.mxu1 %vm787_vm0, %v786_v0  ;;  %632 = vmatpush3.bf16.msra.mxu1 %v681_v31 }
 0x101   :  { %633 = vmatprep.subr.bf16.mxu1 %v786_v0 }
 0x104   :  { %634 = vmatpush3.bf16.msra.mxu1 %v682_v32 }
 0x105   :  { %635 = vmatprep.subr.bf16.mxu1 %v786_v0 }
 0x108   :  { %636 = vmatpush3.bf16.msra.mxu1 %v683_v33 }
 0x109   :  { %637 = vmatprep.subr.bf16.mxu1 %v786_v0 }
 0x10c   :  { %638 = vmatpush3.bf16.msra.mxu1 %v684_v34 }
 0x10d   :  { %639 = vmatprep.subr.bf16.mxu1 %v786_v0 }
 0x110   :  { %640 = vmatpush3.bf16.msra.mxu1 %v685_v35 }
 0x111   :  { %641 = vmatprep.subr.bf16.mxu1 %v786_v0 }
 0x114   :  { %642 = vmatpush3.bf16.msra.mxu1 %v686_v36 }
 0x115   :  { %643 = vmatprep.subr.bf16.mxu1 %v786_v0 }
 0x118   :  { %644 = vmatpush3.bf16.msra.mxu1 %v687_v45 }
 0x119   :  { %645 = vmatprep.subr.bf16.mxu1 %v786_v0 }
 0x11c   :  { %646 = vmatpush3.bf16.msra.mxu1 %v688_v46 }
 0x1bf   :  { %v249_v38 = vpop.f32.mrf.mxu1 }
 0x1c0   :  { %v250_v39 = vadd.f32 %v520_v37, %v249_v38 }
 0x1c1   :  { %v609_v40 = vpop.f32.mrf.mxu1 }
 0x1c2   :  { %v255_v41 = vmax.f32 %v250_v39, 0.0 }
 0x1c3   :  { %v252_v42 = vpop.f32.mrf.mxu1 }
 0x1c4   :  { %v273_v43 = vpack.c.bf16 %v255_v41, %v255_v41 }
 0x1c5   :  { %v610_v44 = vpop.f32.mrf.mxu1 }
 0x1c6   :  { %628 = vmatmul.mubr.bf16.vlgmr.msra.gmra.mxu0 %v273_v43 }
 0x286   :  { %v364_v48 = vpop.f32.mrf.mxu0 }
 0x287   :  { %v365_v49 = vadd.f32 %v529_v47, %v364_v48 }
 0x288   :  { %v629_v50 = vpop.f32.mrf.mxu0 }
 0x289   :  { %v370_v51 = vmax.f32 %v365_v49, 0.0 }
 0x28a   :  { %v367_v52 = vpop.f32.mrf.mxu0 }
 0x28b   :  { %v388_v53 = vpack.c.bf16 %v370_v51, %v370_v51 }
 0x28c   :  { %v630_v54 = vpop.f32.mrf.mxu0 }
 0x28d   :  { %648 = vmatmul.mubr.bf16.vlgmr.msra.gmra.mxu1 %v388_v53 }
 0x34d   :  { %v479_v56 = vpop.f32.mrf.mxu1 }
 0x34e   :  { %v480_v57 = vadd.f32 %v538_v55, %v479_v56 }
 0x34f   :  { %v649_v58 = vpop.f32.mrf.mxu1 }
 0x350   :  { %485 = vmax.xlane.f32.xlu0 %v480_v57 }
 0x351   :  { %v482_v59 = vpop.f32.mrf.mxu1 }
 0x353   :  { %v650_v60 = vpop.f32.mrf.mxu1 }
 0x3d9   :  { %v486_v61 = vpop.xlane.xlu0 %485 }
 0x3da   :  { %v487_v62 = vsub.f32 %v480_v57, %v486_v61 }
 0x3dc   :  { %v488_v63 = vmul.f32 1.442695, %v487_v62 }
 0x3de   :  { %689 = vpow2.f32 %v488_v63 }
 0x3eb   :  { %v690_v0 = vpop.eup %689 }
 0x3ec   :  { %490 = vadd.xlane.f32.xlu0 %v690_v0 }
 0x475   :  { %v491_v1 = vpop.xlane.xlu0 %490 }
 0x476   :  { %691 = vrcp.f32 %v491_v1 }
 0x483   :  { %v692_v2 = vpop.eup %691 }
 0x484   :  { %v493_v3 = vmul.f32 %v692_v2, %v491_v1 }
 0x486   :  { %v494_v4 = vsub.f32 2.0, %v493_v3 }
 0x488   :  { %v495_v5 = vmul.f32 %v692_v2, %v494_v4 }
 0x48a   :  { %v496_v6 = vmul.f32 %v690_v0, %v495_v5 }
 0x48c   :  { %497 = vst [vmem:[#allocation8] sm:$0xff] %v496_v6 }
 0x48d   :  { %764 = shalt.err (!%p761_p5)
}
 0x48e   :  { %507 = dma.vmem_to_hbm [thread:$0]  %s505_s2, 128, %s860_s3, [#allocation4]  }
 0x48f   :  { %777 = dma.done.wait [#allocation4], 128  }
 0x490   :  { %778 = vsyncadd [#allocation4], 4294967168 }
 0x491   :  { %511 = vsyncpa [#allocation3], 1 }
 0x492   :  { %512 = vsyncpa [#allocation6], 1 }
 0x493   :  { %513 = vsyncpa [#allocation4], 1 }

</bundles_post_ra>
